<compile_context>
chip_gen: v7x
topology: tpu7x:2x2x1
jax: 0.10.0
libtpu: 0.0.40
codegen_flags: <defaults>
</compile_context>

<pallas_src>
import jax
import jax.numpy as jnp
from jax.experimental import pallas as pl
from jax.experimental.pallas import tpu as pltpu

BN_EPS = 1e-5


def _pixelwise_kernel(x_ref, w0_ref, b0_ref, w1_ref, b1_ref, w2_ref, b2_ref, o_ref):
    # x_ref block: [1, G, D, Ptile]  (one batch element, all groups, all depths,
    # a lane-dense tile of pixels).
    D = x_ref.shape[2]

    m = None
    for d in range(D):  # D is static and small -> unrolled; max kept in registers
        xd = x_ref[0, :, d, :].astype(jnp.float32)                 # [G, Pt]

        # conv0 (1x1x1, BN scale folded into weights) + shift + ReLU : G -> 16
        h0 = jnp.dot(w0_ref[...], xd, preferred_element_type=jnp.float32)
        h0 = jnp.maximum(h0 + b0_ref[...], 0.0)                    # [16, Pt]

        # conv1 (1x1x1, BN scale folded) + shift + ReLU : 16 -> 8
        h1 = jnp.dot(w1_ref[...], h0, preferred_element_type=jnp.float32)
        h1 = jnp.maximum(h1 + b1_ref[...], 0.0)                    # [8, Pt]

        # conv2 : 8 -> 1  (contraction over sublanes; bias deferred past the max)
        logit = jnp.dot(w2_ref[...], h1, preferred_element_type=jnp.float32)  # [1, Pt]

        m = logit if m is None else jnp.maximum(m, logit)

    # Deferred bias + sigmoid, applied once per pixel after the depth max.
    o_ref[0] = jax.nn.sigmoid(m + b2_ref[0]).astype(o_ref.dtype)


def _pick_pixel_tile(P):
    for t in (4096, 2048, 1024, 512, 256, 128):
        if t <= P and P % t == 0:
            return t
    # Small / unaligned P: full-extent block (masked stores, correct but slower).
    return P


def pixelwise_net(x, folded_params):
    """x: [B, G, D, H, W] (f32 or bf16) -> [B, 1, H, W] in x.dtype."""
    B, G, D, H, W = x.shape
    P = H * W
    Pt = _pick_pixel_tile(P)

    w0, b0, w1, b1, w2, b2 = folded_params
    C0 = w0.shape[0]          # 16
    C1 = w1.shape[0]          # 8

    # Free reshape only -- no transpose, NCDHW memory order preserved.
    xr = x.reshape(B, G, D, P)

    out = pl.pallas_call(
        _pixelwise_kernel,
        out_shape=jax.ShapeDtypeStruct((B, 1, P), x.dtype),
        grid_spec=pltpu.PrefetchScalarGridSpec(
            num_scalar_prefetch=0,
            grid=(B, P // Pt),
            in_specs=[
                pl.BlockSpec((1, G, D, Pt), lambda b, p: (b, 0, 0, p)),  # x slab
                pl.BlockSpec((C0, G), lambda b, p: (0, 0)),              # w0 (BN0 scale folded)
                pl.BlockSpec((C0, 1), lambda b, p: (0, 0)),              # BN0 shift
                pl.BlockSpec((C1, C0), lambda b, p: (0, 0)),             # w1 (BN1 scale folded)
                pl.BlockSpec((C1, 1), lambda b, p: (0, 0)),              # BN1 shift
                pl.BlockSpec((1, C1), lambda b, p: (0, 0)),              # w2
                pl.BlockSpec(memory_space=pltpu.MemorySpace.SMEM),       # b2 scalar
            ],
            out_specs=pl.BlockSpec((1, 1, Pt), lambda b, p: (b, 0, p)),
        ),
        compiler_params=pltpu.CompilerParams(
            dimension_semantics=("parallel", "parallel")),
    )(xr, w0, b0, w1, b1, w2, b2)

    # [B, 1, P] -> [B, 1, H, W]  (free reshape)
    return out.reshape(B, 1, H, W)


def make_params(key, G):
    """Raw PyTorch-style parameters.

    conv0: weight [16, G] (1x1x1 squeezed, no bias), BN0 (gamma, beta, mean, var)
    conv1: weight [8, 16],                           BN1 (gamma, beta, mean, var)
    conv2: weight [1, 8], bias [1]
    """
    ks = jax.random.split(key, 12)
    w0 = 0.3 * jax.random.normal(ks[0], (16, G), jnp.float32)
    bn0 = (1.0 + 0.1 * jax.random.normal(ks[1], (16,), jnp.float32),
           0.1 * jax.random.normal(ks[2], (16,), jnp.float32),
           0.1 * jax.random.normal(ks[3], (16,), jnp.float32),
           0.5 + jax.random.uniform(ks[4], (16,), jnp.float32))
    w1 = 0.3 * jax.random.normal(ks[5], (8, 16), jnp.float32)
    bn1 = (1.0 + 0.1 * jax.random.normal(ks[6], (8,), jnp.float32),
           0.1 * jax.random.normal(ks[7], (8,), jnp.float32),
           0.1 * jax.random.normal(ks[8], (8,), jnp.float32),
           0.5 + jax.random.uniform(ks[9], (8,), jnp.float32))
    w2 = 0.3 * jax.random.normal(ks[10], (1, 8), jnp.float32)
    b2 = 0.1 * jax.random.normal(ks[11], (1,), jnp.float32)
    return (w0, bn0, w1, bn1, w2, b2)


def fold_params(params):
    """Fold eval-mode BN into the conv weights (scale) and a per-channel shift."""
    w0, (g0, be0, m0, v0), w1, (g1, be1, m1, v1), w2, b2 = params
    s0 = g0 / jnp.sqrt(v0 + BN_EPS)
    s1 = g1 / jnp.sqrt(v1 + BN_EPS)
    w0f = (w0 * s0[:, None]).astype(jnp.float32)          # [16, G]
    b0f = (be0 - m0 * s0).reshape(-1, 1).astype(jnp.float32)   # [16, 1]
    w1f = (w1 * s1[:, None]).astype(jnp.float32)          # [8, 16]
    b1f = (be1 - m1 * s1).reshape(-1, 1).astype(jnp.float32)   # [8, 1]
    return (w0f, b0f, w1f, b1f, w2.astype(jnp.float32), b2.astype(jnp.float32))


def reference_forward(x, params):
    """Pure-JAX reference of PixelwiseNet.forward (eval-mode BN, raw params)."""
    w0, (g0, be0, m0, v0), w1, (g1, be1, m1, v1), w2, b2 = params
    xr = jnp.transpose(x.astype(jnp.float32), (0, 2, 3, 4, 1))       # [B, D, H, W, G]
    h0 = xr @ w0.T
    h0 = jnp.maximum((h0 - m0) / jnp.sqrt(v0 + BN_EPS) * g0 + be0, 0.0)
    h1 = h0 @ w1.T
    h1 = jnp.maximum((h1 - m1) / jnp.sqrt(v1 + BN_EPS) * g1 + be1, 0.0)
    y = jax.nn.sigmoid(h1 @ w2.T + b2)[..., 0]                       # [B, D, H, W]
    return jnp.max(y, axis=1)[:, None, :, :]                         # [B, 1, H, W]


if __name__ == "__main__":
    B, G, D, H, W = 2, 4, 8, 16, 16
    key = jax.random.PRNGKey(0)
    kx, kp = jax.random.split(key)
    x = jax.random.normal(kx, (B, G, D, H, W), jnp.float32)
    params = make_params(kp, G)
    folded = fold_params(params)

    ref = reference_forward(x, params)

    # f32 path
    out = jax.block_until_ready(pixelwise_net(x, folded))
    assert out.shape == (B, 1, H, W), out.shape
    assert jnp.allclose(out, ref, atol=1e-5, rtol=1e-5), \
        float(jnp.max(jnp.abs(out - ref)))

    # bf16 input path (halves HBM bytes for the memory-bound read of x; compute stays f32)
    out_bf16 = jax.block_until_ready(pixelwise_net(x.astype(jnp.bfloat16), folded))
    assert out_bf16.shape == (B, 1, H, W), out_bf16.shape
    assert jnp.allclose(out_bf16.astype(jnp.float32), ref, atol=5e-2), \
        float(jnp.max(jnp.abs(out_bf16.astype(jnp.float32) - ref)))

    print("KERNEL_OK")
</pallas_src>

<mosaic_0001>
module attributes {stable_mosaic.version = 11 : i64} {
  func.func @_pixelwise_kernel(%arg0: i32, %arg1: i32, %arg2: memref<1x4x8x256xf32, #tpu.memory_space<vmem>>, %arg3: memref<16x4xf32, #tpu.memory_space<vmem>>, %arg4: memref<16x1xf32, #tpu.memory_space<vmem>>, %arg5: memref<8x16xf32, #tpu.memory_space<vmem>>, %arg6: memref<8x1xf32, #tpu.memory_space<vmem>>, %arg7: memref<1x8xf32, #tpu.memory_space<vmem>>, %arg8: memref<1xf32, #tpu.memory_space<smem>>, %arg9: memref<1x1x256xf32, #tpu.memory_space<vmem>>) attributes {dimension_semantics = [#tpu.dimension_semantics<parallel>, #tpu.dimension_semantics<parallel>], iteration_bounds = array<i64: 2, 1>, scalar_prefetch = 0 : i64, scratch_operands = 0 : i64, tpu.core_type = #tpu.core_type<tc>, window_params = [{transform_indices = @transform_0, window_bounds = array<i64: 1, 4, 8, 256>}, {pipeline_mode = #tpu.pipeline_mode<synchronous>, transform_indices = @transform_1, window_bounds = array<i64: 16, 4>}, {pipeline_mode = #tpu.pipeline_mode<synchronous>, transform_indices = @transform_2, window_bounds = array<i64: 16, 1>}, {pipeline_mode = #tpu.pipeline_mode<synchronous>, transform_indices = @transform_3, window_bounds = array<i64: 8, 16>}, {pipeline_mode = #tpu.pipeline_mode<synchronous>, transform_indices = @transform_4, window_bounds = array<i64: 8, 1>}, {pipeline_mode = #tpu.pipeline_mode<synchronous>, transform_indices = @transform_5, window_bounds = array<i64: 1, 8>}, {transform_indices = @transform_6, window_bounds = array<i64: 1>}, {transform_indices = @transform_7, window_bounds = array<i64: 1, 1, 256>}]} {
    %c0 = arith.constant 0 : index
    %c0_0 = arith.constant 0 : index
    %c0_1 = arith.constant 0 : index
    %c0_2 = arith.constant 0 : index
    %0 = vector.load %arg2[%c0, %c0_0, %c0_1, %c0_2] : memref<1x4x8x256xf32, #tpu.memory_space<vmem>>, vector<1x4x1x256xf32>
    %1 = vector.shape_cast %0 : vector<1x4x1x256xf32> to vector<4x256xf32>
    %c0_3 = arith.constant 0 : index
    %c0_4 = arith.constant 0 : index
    %2 = vector.load %arg3[%c0_3, %c0_4] : memref<16x4xf32, #tpu.memory_space<vmem>>, vector<16x4xf32>
    %cst = arith.constant dense<0.000000e+00> : vector<16x256xf32>
    %3 = tpu.matmul %2, %1, %cst {dimension_numbers = #tpu.dot_dimension_numbers<[1], [0], [0], [1], [0, 0, 1, 1], [], []>} : vector<16x4xf32>, vector<4x256xf32>, vector<16x256xf32> -> vector<16x256xf32>
    %c0_5 = arith.constant 0 : index
    %c0_6 = arith.constant 0 : index
    %4 = vector.load %arg4[%c0_5, %c0_6] : memref<16x1xf32, #tpu.memory_space<vmem>>, vector<16x1xf32>
    %5 = vector.broadcast %4 : vector<16x1xf32> to vector<16x256xf32>
    %6 = arith.addf %3, %5 : vector<16x256xf32>
    %cst_7 = arith.constant 0.000000e+00 : f32
    %7 = vector.broadcast %cst_7 : f32 to vector<16x256xf32>
    %8 = arith.maximumf %6, %7 : vector<16x256xf32>
    %c0_8 = arith.constant 0 : index
    %c0_9 = arith.constant 0 : index
    %9 = vector.load %arg5[%c0_8, %c0_9] : memref<8x16xf32, #tpu.memory_space<vmem>>, vector<8x16xf32>
    %cst_10 = arith.constant dense<0.000000e+00> : vector<8x256xf32>
    %10 = tpu.matmul %9, %8, %cst_10 {dimension_numbers = #tpu.dot_dimension_numbers<[1], [0], [0], [1], [0, 0, 1, 1], [], []>} : vector<8x16xf32>, vector<16x256xf32>, vector<8x256xf32> -> vector<8x256xf32>
    %c0_11 = arith.constant 0 : index
    %c0_12 = arith.constant 0 : index
    %11 = vector.load %arg6[%c0_11, %c0_12] : memref<8x1xf32, #tpu.memory_space<vmem>>, vector<8x1xf32>
    %12 = vector.broadcast %11 : vector<8x1xf32> to vector<8x256xf32>
    %13 = arith.addf %10, %12 : vector<8x256xf32>
    %cst_13 = arith.constant 0.000000e+00 : f32
    %14 = vector.broadcast %cst_13 : f32 to vector<8x256xf32>
    %15 = arith.maximumf %13, %14 : vector<8x256xf32>
    %c0_14 = arith.constant 0 : index
    %c0_15 = arith.constant 0 : index
    %16 = vector.load %arg7[%c0_14, %c0_15] : memref<1x8xf32, #tpu.memory_space<vmem>>, vector<1x8xf32>
    %cst_16 = arith.constant dense<0.000000e+00> : vector<1x256xf32>
    %17 = tpu.matmul %16, %15, %cst_16 {dimension_numbers = #tpu.dot_dimension_numbers<[1], [0], [0], [1], [0, 0, 1, 1], [], []>} : vector<1x8xf32>, vector<8x256xf32>, vector<1x256xf32> -> vector<1x256xf32>
    %c0_17 = arith.constant 0 : index
    %c0_18 = arith.constant 0 : index
    %c1 = arith.constant 1 : index
    %c0_19 = arith.constant 0 : index
    %18 = vector.load %arg2[%c0_17, %c0_18, %c1, %c0_19] : memref<1x4x8x256xf32, #tpu.memory_space<vmem>>, vector<1x4x1x256xf32>
    %19 = vector.shape_cast %18 : vector<1x4x1x256xf32> to vector<4x256xf32>
    %c0_20 = arith.constant 0 : index
    %c0_21 = arith.constant 0 : index
    %20 = vector.load %arg3[%c0_20, %c0_21] : memref<16x4xf32, #tpu.memory_space<vmem>>, vector<16x4xf32>
    %cst_22 = arith.constant dense<0.000000e+00> : vector<16x256xf32>
    %21 = tpu.matmul %20, %19, %cst_22 {dimension_numbers = #tpu.dot_dimension_numbers<[1], [0], [0], [1], [0, 0, 1, 1], [], []>} : vector<16x4xf32>, vector<4x256xf32>, vector<16x256xf32> -> vector<16x256xf32>
    %c0_23 = arith.constant 0 : index
    %c0_24 = arith.constant 0 : index
    %22 = vector.load %arg4[%c0_23, %c0_24] : memref<16x1xf32, #tpu.memory_space<vmem>>, vector<16x1xf32>
    %23 = vector.broadcast %22 : vector<16x1xf32> to vector<16x256xf32>
    %24 = arith.addf %21, %23 : vector<16x256xf32>
    %cst_25 = arith.constant 0.000000e+00 : f32
    %25 = vector.broadcast %cst_25 : f32 to vector<16x256xf32>
    %26 = arith.maximumf %24, %25 : vector<16x256xf32>
    %c0_26 = arith.constant 0 : index
    %c0_27 = arith.constant 0 : index
    %27 = vector.load %arg5[%c0_26, %c0_27] : memref<8x16xf32, #tpu.memory_space<vmem>>, vector<8x16xf32>
    %cst_28 = arith.constant dense<0.000000e+00> : vector<8x256xf32>
    %28 = tpu.matmul %27, %26, %cst_28 {dimension_numbers = #tpu.dot_dimension_numbers<[1], [0], [0], [1], [0, 0, 1, 1], [], []>} : vector<8x16xf32>, vector<16x256xf32>, vector<8x256xf32> -> vector<8x256xf32>
    %c0_29 = arith.constant 0 : index
    %c0_30 = arith.constant 0 : index
    %29 = vector.load %arg6[%c0_29, %c0_30] : memref<8x1xf32, #tpu.memory_space<vmem>>, vector<8x1xf32>
    %30 = vector.broadcast %29 : vector<8x1xf32> to vector<8x256xf32>
    %31 = arith.addf %28, %30 : vector<8x256xf32>
    %cst_31 = arith.constant 0.000000e+00 : f32
    %32 = vector.broadcast %cst_31 : f32 to vector<8x256xf32>
    %33 = arith.maximumf %31, %32 : vector<8x256xf32>
    %c0_32 = arith.constant 0 : index
    %c0_33 = arith.constant 0 : index
    %34 = vector.load %arg7[%c0_32, %c0_33] : memref<1x8xf32, #tpu.memory_space<vmem>>, vector<1x8xf32>
    %cst_34 = arith.constant dense<0.000000e+00> : vector<1x256xf32>
    %35 = tpu.matmul %34, %33, %cst_34 {dimension_numbers = #tpu.dot_dimension_numbers<[1], [0], [0], [1], [0, 0, 1, 1], [], []>} : vector<1x8xf32>, vector<8x256xf32>, vector<1x256xf32> -> vector<1x256xf32>
    %36 = arith.maximumf %17, %35 : vector<1x256xf32>
    %c0_35 = arith.constant 0 : index
    %c0_36 = arith.constant 0 : index
    %c2 = arith.constant 2 : index
    %c0_37 = arith.constant 0 : index
    %37 = vector.load %arg2[%c0_35, %c0_36, %c2, %c0_37] : memref<1x4x8x256xf32, #tpu.memory_space<vmem>>, vector<1x4x1x256xf32>
    %38 = vector.shape_cast %37 : vector<1x4x1x256xf32> to vector<4x256xf32>
    %c0_38 = arith.constant 0 : index
    %c0_39 = arith.constant 0 : index
    %39 = vector.load %arg3[%c0_38, %c0_39] : memref<16x4xf32, #tpu.memory_space<vmem>>, vector<16x4xf32>
    %cst_40 = arith.constant dense<0.000000e+00> : vector<16x256xf32>
    %40 = tpu.matmul %39, %38, %cst_40 {dimension_numbers = #tpu.dot_dimension_numbers<[1], [0], [0], [1], [0, 0, 1, 1], [], []>} : vector<16x4xf32>, vector<4x256xf32>, vector<16x256xf32> -> vector<16x256xf32>
    %c0_41 = arith.constant 0 : index
    %c0_42 = arith.constant 0 : index
    %41 = vector.load %arg4[%c0_41, %c0_42] : memref<16x1xf32, #tpu.memory_space<vmem>>, vector<16x1xf32>
    %42 = vector.broadcast %41 : vector<16x1xf32> to vector<16x256xf32>
    %43 = arith.addf %40, %42 : vector<16x256xf32>
    %cst_43 = arith.constant 0.000000e+00 : f32
    %44 = vector.broadcast %cst_43 : f32 to vector<16x256xf32>
    %45 = arith.maximumf %43, %44 : vector<16x256xf32>
    %c0_44 = arith.constant 0 : index
    %c0_45 = arith.constant 0 : index
    %46 = vector.load %arg5[%c0_44, %c0_45] : memref<8x16xf32, #tpu.memory_space<vmem>>, vector<8x16xf32>
    %cst_46 = arith.constant dense<0.000000e+00> : vector<8x256xf32>
    %47 = tpu.matmul %46, %45, %cst_46 {dimension_numbers = #tpu.dot_dimension_numbers<[1], [0], [0], [1], [0, 0, 1, 1], [], []>} : vector<8x16xf32>, vector<16x256xf32>, vector<8x256xf32> -> vector<8x256xf32>
    %c0_47 = arith.constant 0 : index
    %c0_48 = arith.constant 0 : index
    %48 = vector.load %arg6[%c0_47, %c0_48] : memref<8x1xf32, #tpu.memory_space<vmem>>, vector<8x1xf32>
    %49 = vector.broadcast %48 : vector<8x1xf32> to vector<8x256xf32>
    %50 = arith.addf %47, %49 : vector<8x256xf32>
    %cst_49 = arith.constant 0.000000e+00 : f32
    %51 = vector.broadcast %cst_49 : f32 to vector<8x256xf32>
    %52 = arith.maximumf %50, %51 : vector<8x256xf32>
    %c0_50 = arith.constant 0 : index
    %c0_51 = arith.constant 0 : index
    %53 = vector.load %arg7[%c0_50, %c0_51] : memref<1x8xf32, #tpu.memory_space<vmem>>, vector<1x8xf32>
    %cst_52 = arith.constant dense<0.000000e+00> : vector<1x256xf32>
    %54 = tpu.matmul %53, %52, %cst_52 {dimension_numbers = #tpu.dot_dimension_numbers<[1], [0], [0], [1], [0, 0, 1, 1], [], []>} : vector<1x8xf32>, vector<8x256xf32>, vector<1x256xf32> -> vector<1x256xf32>
    %55 = arith.maximumf %36, %54 : vector<1x256xf32>
    %c0_53 = arith.constant 0 : index
    %c0_54 = arith.constant 0 : index
    %c3 = arith.constant 3 : index
    %c0_55 = arith.constant 0 : index
    %56 = vector.load %arg2[%c0_53, %c0_54, %c3, %c0_55] : memref<1x4x8x256xf32, #tpu.memory_space<vmem>>, vector<1x4x1x256xf32>
    %57 = vector.shape_cast %56 : vector<1x4x1x256xf32> to vector<4x256xf32>
    %c0_56 = arith.constant 0 : index
    %c0_57 = arith.constant 0 : index
    %58 = vector.load %arg3[%c0_56, %c0_57] : memref<16x4xf32, #tpu.memory_space<vmem>>, vector<16x4xf32>
    %cst_58 = arith.constant dense<0.000000e+00> : vector<16x256xf32>
    %59 = tpu.matmul %58, %57, %cst_58 {dimension_numbers = #tpu.dot_dimension_numbers<[1], [0], [0], [1], [0, 0, 1, 1], [], []>} : vector<16x4xf32>, vector<4x256xf32>, vector<16x256xf32> -> vector<16x256xf32>
    %c0_59 = arith.constant 0 : index
    %c0_60 = arith.constant 0 : index
    %60 = vector.load %arg4[%c0_59, %c0_60] : memref<16x1xf32, #tpu.memory_space<vmem>>, vector<16x1xf32>
    %61 = vector.broadcast %60 : vector<16x1xf32> to vector<16x256xf32>
    %62 = arith.addf %59, %61 : vector<16x256xf32>
    %cst_61 = arith.constant 0.000000e+00 : f32
    %63 = vector.broadcast %cst_61 : f32 to vector<16x256xf32>
    %64 = arith.maximumf %62, %63 : vector<16x256xf32>
    %c0_62 = arith.constant 0 : index
    %c0_63 = arith.constant 0 : index
    %65 = vector.load %arg5[%c0_62, %c0_63] : memref<8x16xf32, #tpu.memory_space<vmem>>, vector<8x16xf32>
    %cst_64 = arith.constant dense<0.000000e+00> : vector<8x256xf32>
    %66 = tpu.matmul %65, %64, %cst_64 {dimension_numbers = #tpu.dot_dimension_numbers<[1], [0], [0], [1], [0, 0, 1, 1], [], []>} : vector<8x16xf32>, vector<16x256xf32>, vector<8x256xf32> -> vector<8x256xf32>
    %c0_65 = arith.constant 0 : index
    %c0_66 = arith.constant 0 : index
    %67 = vector.load %arg6[%c0_65, %c0_66] : memref<8x1xf32, #tpu.memory_space<vmem>>, vector<8x1xf32>
    %68 = vector.broadcast %67 : vector<8x1xf32> to vector<8x256xf32>
    %69 = arith.addf %66, %68 : vector<8x256xf32>
    %cst_67 = arith.constant 0.000000e+00 : f32
    %70 = vector.broadcast %cst_67 : f32 to vector<8x256xf32>
    %71 = arith.maximumf %69, %70 : vector<8x256xf32>
    %c0_68 = arith.constant 0 : index
    %c0_69 = arith.constant 0 : index
    %72 = vector.load %arg7[%c0_68, %c0_69] : memref<1x8xf32, #tpu.memory_space<vmem>>, vector<1x8xf32>
    %cst_70 = arith.constant dense<0.000000e+00> : vector<1x256xf32>
    %73 = tpu.matmul %72, %71, %cst_70 {dimension_numbers = #tpu.dot_dimension_numbers<[1], [0], [0], [1], [0, 0, 1, 1], [], []>} : vector<1x8xf32>, vector<8x256xf32>, vector<1x256xf32> -> vector<1x256xf32>
    %74 = arith.maximumf %55, %73 : vector<1x256xf32>
    %c0_71 = arith.constant 0 : index
    %c0_72 = arith.constant 0 : index
    %c4 = arith.constant 4 : index
    %c0_73 = arith.constant 0 : index
    %75 = vector.load %arg2[%c0_71, %c0_72, %c4, %c0_73] : memref<1x4x8x256xf32, #tpu.memory_space<vmem>>, vector<1x4x1x256xf32>
    %76 = vector.shape_cast %75 : vector<1x4x1x256xf32> to vector<4x256xf32>
    %c0_74 = arith.constant 0 : index
    %c0_75 = arith.constant 0 : index
    %77 = vector.load %arg3[%c0_74, %c0_75] : memref<16x4xf32, #tpu.memory_space<vmem>>, vector<16x4xf32>
    %cst_76 = arith.constant dense<0.000000e+00> : vector<16x256xf32>
    %78 = tpu.matmul %77, %76, %cst_76 {dimension_numbers = #tpu.dot_dimension_numbers<[1], [0], [0], [1], [0, 0, 1, 1], [], []>} : vector<16x4xf32>, vector<4x256xf32>, vector<16x256xf32> -> vector<16x256xf32>
    %c0_77 = arith.constant 0 : index
    %c0_78 = arith.constant 0 : index
    %79 = vector.load %arg4[%c0_77, %c0_78] : memref<16x1xf32, #tpu.memory_space<vmem>>, vector<16x1xf32>
    %80 = vector.broadcast %79 : vector<16x1xf32> to vector<16x256xf32>
    %81 = arith.addf %78, %80 : vector<16x256xf32>
    %cst_79 = arith.constant 0.000000e+00 : f32
    %82 = vector.broadcast %cst_79 : f32 to vector<16x256xf32>
    %83 = arith.maximumf %81, %82 : vector<16x256xf32>
    %c0_80 = arith.constant 0 : index
    %c0_81 = arith.constant 0 : index
    %84 = vector.load %arg5[%c0_80, %c0_81] : memref<8x16xf32, #tpu.memory_space<vmem>>, vector<8x16xf32>
    %cst_82 = arith.constant dense<0.000000e+00> : vector<8x256xf32>
    %85 = tpu.matmul %84, %83, %cst_82 {dimension_numbers = #tpu.dot_dimension_numbers<[1], [0], [0], [1], [0, 0, 1, 1], [], []>} : vector<8x16xf32>, vector<16x256xf32>, vector<8x256xf32> -> vector<8x256xf32>
    %c0_83 = arith.constant 0 : index
    %c0_84 = arith.constant 0 : index
    %86 = vector.load %arg6[%c0_83, %c0_84] : memref<8x1xf32, #tpu.memory_space<vmem>>, vector<8x1xf32>
    %87 = vector.broadcast %86 : vector<8x1xf32> to vector<8x256xf32>
    %88 = arith.addf %85, %87 : vector<8x256xf32>
    %cst_85 = arith.constant 0.000000e+00 : f32
    %89 = vector.broadcast %cst_85 : f32 to vector<8x256xf32>
    %90 = arith.maximumf %88, %89 : vector<8x256xf32>
    %c0_86 = arith.constant 0 : index
    %c0_87 = arith.constant 0 : index
    %91 = vector.load %arg7[%c0_86, %c0_87] : memref<1x8xf32, #tpu.memory_space<vmem>>, vector<1x8xf32>
    %cst_88 = arith.constant dense<0.000000e+00> : vector<1x256xf32>
    %92 = tpu.matmul %91, %90, %cst_88 {dimension_numbers = #tpu.dot_dimension_numbers<[1], [0], [0], [1], [0, 0, 1, 1], [], []>} : vector<1x8xf32>, vector<8x256xf32>, vector<1x256xf32> -> vector<1x256xf32>
    %93 = arith.maximumf %74, %92 : vector<1x256xf32>
    %c0_89 = arith.constant 0 : index
    %c0_90 = arith.constant 0 : index
    %c5 = arith.constant 5 : index
    %c0_91 = arith.constant 0 : index
    %94 = vector.load %arg2[%c0_89, %c0_90, %c5, %c0_91] : memref<1x4x8x256xf32, #tpu.memory_space<vmem>>, vector<1x4x1x256xf32>
    %95 = vector.shape_cast %94 : vector<1x4x1x256xf32> to vector<4x256xf32>
    %c0_92 = arith.constant 0 : index
    %c0_93 = arith.constant 0 : index
    %96 = vector.load %arg3[%c0_92, %c0_93] : memref<16x4xf32, #tpu.memory_space<vmem>>, vector<16x4xf32>
    %cst_94 = arith.constant dense<0.000000e+00> : vector<16x256xf32>
    %97 = tpu.matmul %96, %95, %cst_94 {dimension_numbers = #tpu.dot_dimension_numbers<[1], [0], [0], [1], [0, 0, 1, 1], [], []>} : vector<16x4xf32>, vector<4x256xf32>, vector<16x256xf32> -> vector<16x256xf32>
    %c0_95 = arith.constant 0 : index
    %c0_96 = arith.constant 0 : index
    %98 = vector.load %arg4[%c0_95, %c0_96] : memref<16x1xf32, #tpu.memory_space<vmem>>, vector<16x1xf32>
    %99 = vector.broadcast %98 : vector<16x1xf32> to vector<16x256xf32>
    %100 = arith.addf %97, %99 : vector<16x256xf32>
    %cst_97 = arith.constant 0.000000e+00 : f32
    %101 = vector.broadcast %cst_97 : f32 to vector<16x256xf32>
    %102 = arith.maximumf %100, %101 : vector<16x256xf32>
    %c0_98 = arith.constant 0 : index
    %c0_99 = arith.constant 0 : index
    %103 = vector.load %arg5[%c0_98, %c0_99] : memref<8x16xf32, #tpu.memory_space<vmem>>, vector<8x16xf32>
    %cst_100 = arith.constant dense<0.000000e+00> : vector<8x256xf32>
    %104 = tpu.matmul %103, %102, %cst_100 {dimension_numbers = #tpu.dot_dimension_numbers<[1], [0], [0], [1], [0, 0, 1, 1], [], []>} : vector<8x16xf32>, vector<16x256xf32>, vector<8x256xf32> -> vector<8x256xf32>
    %c0_101 = arith.constant 0 : index
    %c0_102 = arith.constant 0 : index
    %105 = vector.load %arg6[%c0_101, %c0_102] : memref<8x1xf32, #tpu.memory_space<vmem>>, vector<8x1xf32>
    %106 = vector.broadcast %105 : vector<8x1xf32> to vector<8x256xf32>
    %107 = arith.addf %104, %106 : vector<8x256xf32>
    %cst_103 = arith.constant 0.000000e+00 : f32
    %108 = vector.broadcast %cst_103 : f32 to vector<8x256xf32>
    %109 = arith.maximumf %107, %108 : vector<8x256xf32>
    %c0_104 = arith.constant 0 : index
    %c0_105 = arith.constant 0 : index
    %110 = vector.load %arg7[%c0_104, %c0_105] : memref<1x8xf32, #tpu.memory_space<vmem>>, vector<1x8xf32>
    %cst_106 = arith.constant dense<0.000000e+00> : vector<1x256xf32>
    %111 = tpu.matmul %110, %109, %cst_106 {dimension_numbers = #tpu.dot_dimension_numbers<[1], [0], [0], [1], [0, 0, 1, 1], [], []>} : vector<1x8xf32>, vector<8x256xf32>, vector<1x256xf32> -> vector<1x256xf32>
    %112 = arith.maximumf %93, %111 : vector<1x256xf32>
    %c0_107 = arith.constant 0 : index
    %c0_108 = arith.constant 0 : index
    %c6 = arith.constant 6 : index
    %c0_109 = arith.constant 0 : index
    %113 = vector.load %arg2[%c0_107, %c0_108, %c6, %c0_109] : memref<1x4x8x256xf32, #tpu.memory_space<vmem>>, vector<1x4x1x256xf32>
    %114 = vector.shape_cast %113 : vector<1x4x1x256xf32> to vector<4x256xf32>
    %c0_110 = arith.constant 0 : index
    %c0_111 = arith.constant 0 : index
    %115 = vector.load %arg3[%c0_110, %c0_111] : memref<16x4xf32, #tpu.memory_space<vmem>>, vector<16x4xf32>
    %cst_112 = arith.constant dense<0.000000e+00> : vector<16x256xf32>
    %116 = tpu.matmul %115, %114, %cst_112 {dimension_numbers = #tpu.dot_dimension_numbers<[1], [0], [0], [1], [0, 0, 1, 1], [], []>} : vector<16x4xf32>, vector<4x256xf32>, vector<16x256xf32> -> vector<16x256xf32>
    %c0_113 = arith.constant 0 : index
    %c0_114 = arith.constant 0 : index
    %117 = vector.load %arg4[%c0_113, %c0_114] : memref<16x1xf32, #tpu.memory_space<vmem>>, vector<16x1xf32>
    %118 = vector.broadcast %117 : vector<16x1xf32> to vector<16x256xf32>
    %119 = arith.addf %116, %118 : vector<16x256xf32>
    %cst_115 = arith.constant 0.000000e+00 : f32
    %120 = vector.broadcast %cst_115 : f32 to vector<16x256xf32>
    %121 = arith.maximumf %119, %120 : vector<16x256xf32>
    %c0_116 = arith.constant 0 : index
    %c0_117 = arith.constant 0 : index
    %122 = vector.load %arg5[%c0_116, %c0_117] : memref<8x16xf32, #tpu.memory_space<vmem>>, vector<8x16xf32>
    %cst_118 = arith.constant dense<0.000000e+00> : vector<8x256xf32>
    %123 = tpu.matmul %122, %121, %cst_118 {dimension_numbers = #tpu.dot_dimension_numbers<[1], [0], [0], [1], [0, 0, 1, 1], [], []>} : vector<8x16xf32>, vector<16x256xf32>, vector<8x256xf32> -> vector<8x256xf32>
    %c0_119 = arith.constant 0 : index
    %c0_120 = arith.constant 0 : index
    %124 = vector.load %arg6[%c0_119, %c0_120] : memref<8x1xf32, #tpu.memory_space<vmem>>, vector<8x1xf32>
    %125 = vector.broadcast %124 : vector<8x1xf32> to vector<8x256xf32>
    %126 = arith.addf %123, %125 : vector<8x256xf32>
    %cst_121 = arith.constant 0.000000e+00 : f32
    %127 = vector.broadcast %cst_121 : f32 to vector<8x256xf32>
    %128 = arith.maximumf %126, %127 : vector<8x256xf32>
    %c0_122 = arith.constant 0 : index
    %c0_123 = arith.constant 0 : index
    %129 = vector.load %arg7[%c0_122, %c0_123] : memref<1x8xf32, #tpu.memory_space<vmem>>, vector<1x8xf32>
    %cst_124 = arith.constant dense<0.000000e+00> : vector<1x256xf32>
    %130 = tpu.matmul %129, %128, %cst_124 {dimension_numbers = #tpu.dot_dimension_numbers<[1], [0], [0], [1], [0, 0, 1, 1], [], []>} : vector<1x8xf32>, vector<8x256xf32>, vector<1x256xf32> -> vector<1x256xf32>
    %131 = arith.maximumf %112, %130 : vector<1x256xf32>
    %c0_125 = arith.constant 0 : index
    %c0_126 = arith.constant 0 : index
    %c7 = arith.constant 7 : index
    %c0_127 = arith.constant 0 : index
    %132 = vector.load %arg2[%c0_125, %c0_126, %c7, %c0_127] : memref<1x4x8x256xf32, #tpu.memory_space<vmem>>, vector<1x4x1x256xf32>
    %133 = vector.shape_cast %132 : vector<1x4x1x256xf32> to vector<4x256xf32>
    %c0_128 = arith.constant 0 : index
    %c0_129 = arith.constant 0 : index
    %134 = vector.load %arg3[%c0_128, %c0_129] : memref<16x4xf32, #tpu.memory_space<vmem>>, vector<16x4xf32>
    %cst_130 = arith.constant dense<0.000000e+00> : vector<16x256xf32>
    %135 = tpu.matmul %134, %133, %cst_130 {dimension_numbers = #tpu.dot_dimension_numbers<[1], [0], [0], [1], [0, 0, 1, 1], [], []>} : vector<16x4xf32>, vector<4x256xf32>, vector<16x256xf32> -> vector<16x256xf32>
    %c0_131 = arith.constant 0 : index
    %c0_132 = arith.constant 0 : index
    %136 = vector.load %arg4[%c0_131, %c0_132] : memref<16x1xf32, #tpu.memory_space<vmem>>, vector<16x1xf32>
    %137 = vector.broadcast %136 : vector<16x1xf32> to vector<16x256xf32>
    %138 = arith.addf %135, %137 : vector<16x256xf32>
    %cst_133 = arith.constant 0.000000e+00 : f32
    %139 = vector.broadcast %cst_133 : f32 to vector<16x256xf32>
    %140 = arith.maximumf %138, %139 : vector<16x256xf32>
    %c0_134 = arith.constant 0 : index
    %c0_135 = arith.constant 0 : index
    %141 = vector.load %arg5[%c0_134, %c0_135] : memref<8x16xf32, #tpu.memory_space<vmem>>, vector<8x16xf32>
    %cst_136 = arith.constant dense<0.000000e+00> : vector<8x256xf32>
    %142 = tpu.matmul %141, %140, %cst_136 {dimension_numbers = #tpu.dot_dimension_numbers<[1], [0], [0], [1], [0, 0, 1, 1], [], []>} : vector<8x16xf32>, vector<16x256xf32>, vector<8x256xf32> -> vector<8x256xf32>
    %c0_137 = arith.constant 0 : index
    %c0_138 = arith.constant 0 : index
    %143 = vector.load %arg6[%c0_137, %c0_138] : memref<8x1xf32, #tpu.memory_space<vmem>>, vector<8x1xf32>
    %144 = vector.broadcast %143 : vector<8x1xf32> to vector<8x256xf32>
    %145 = arith.addf %142, %144 : vector<8x256xf32>
    %cst_139 = arith.constant 0.000000e+00 : f32
    %146 = vector.broadcast %cst_139 : f32 to vector<8x256xf32>
    %147 = arith.maximumf %145, %146 : vector<8x256xf32>
    %c0_140 = arith.constant 0 : index
    %c0_141 = arith.constant 0 : index
    %148 = vector.load %arg7[%c0_140, %c0_141] : memref<1x8xf32, #tpu.memory_space<vmem>>, vector<1x8xf32>
    %cst_142 = arith.constant dense<0.000000e+00> : vector<1x256xf32>
    %149 = tpu.matmul %148, %147, %cst_142 {dimension_numbers = #tpu.dot_dimension_numbers<[1], [0], [0], [1], [0, 0, 1, 1], [], []>} : vector<1x8xf32>, vector<8x256xf32>, vector<1x256xf32> -> vector<1x256xf32>
    %150 = arith.maximumf %131, %149 : vector<1x256xf32>
    %c0_143 = arith.constant 0 : index
    %151 = memref.load %arg8[%c0_143] : memref<1xf32, #tpu.memory_space<smem>>
    %152 = vector.broadcast %151 : f32 to vector<1x256xf32>
    %153 = arith.addf %150, %152 : vector<1x256xf32>
    %154 = arith.negf %153 : vector<1x256xf32>
    %155 = math.exp %154 : vector<1x256xf32>
    %cst_144 = arith.constant 1.000000e+00 : f32
    %156 = vector.broadcast %cst_144 : f32 to vector<1x256xf32>
    %157 = arith.addf %156, %155 : vector<1x256xf32>
    %158 = arith.divf %156, %157 : vector<1x256xf32>
    %c0_145 = arith.constant 0 : index
    %c0_146 = arith.constant 0 : index
    %c0_147 = arith.constant 0 : index
    %159 = vector.load %arg9[%c0_145, %c0_146, %c0_147] : memref<1x1x256xf32, #tpu.memory_space<vmem>>, vector<1x1x256xf32>
    %160 = vector.shape_cast %159 : vector<1x1x256xf32> to vector<1x256xf32>
    %161 = vector.shape_cast %158 : vector<1x256xf32> to vector<1x1x256xf32>
    tpu.vector_store %arg9[%c0_145, %c0_146, %c0_147], %161 {strides = array<i32>} : memref<1x1x256xf32, #tpu.memory_space<vmem>>, vector<1x1x256xf32>,
    return
  }
  func.func @transform_0(%arg0: i32, %arg1: i32) -> (i32, i32, i32, i32) {
    %c0_i32 = arith.constant 0 : i32
    %c0_i32_0 = arith.constant 0 : i32
    %c0_i32_1 = arith.constant 0 : i32
    return %arg0, %c0_i32, %c0_i32_0, %arg1 : i32, i32, i32, i32
  }
  func.func @transform_1(%arg0: i32, %arg1: i32) -> (i32, i32) {
    %c0_i32 = arith.constant 0 : i32
    %c0_i32_0 = arith.constant 0 : i32
    %c0_i32_1 = arith.constant 0 : i32
    return %c0_i32, %c0_i32_0 : i32, i32
  }
  func.func @transform_2(%arg0: i32, %arg1: i32) -> (i32, i32) {
    %c0_i32 = arith.constant 0 : i32
    %c0_i32_0 = arith.constant 0 : i32
    %c0_i32_1 = arith.constant 0 : i32
    return %c0_i32, %c0_i32_0 : i32, i32
  }
  func.func @transform_3(%arg0: i32, %arg1: i32) -> (i32, i32) {
    %c0_i32 = arith.constant 0 : i32
    %c0_i32_0 = arith.constant 0 : i32
    %c0_i32_1 = arith.constant 0 : i32
    return %c0_i32, %c0_i32_0 : i32, i32
  }
  func.func @transform_4(%arg0: i32, %arg1: i32) -> (i32, i32) {
    %c0_i32 = arith.constant 0 : i32
    %c0_i32_0 = arith.constant 0 : i32
    %c0_i32_1 = arith.constant 0 : i32
    return %c0_i32, %c0_i32_0 : i32, i32
  }
  func.func @transform_5(%arg0: i32, %arg1: i32) -> (i32, i32) {
    %c0_i32 = arith.constant 0 : i32
    %c0_i32_0 = arith.constant 0 : i32
    %c0_i32_1 = arith.constant 0 : i32
    return %c0_i32, %c0_i32_0 : i32, i32
  }
  func.func @transform_6(%arg0: i32, %arg1: i32) -> i32 {
    %c0_i32 = arith.constant 0 : i32
    %c0_i32_0 = arith.constant 0 : i32
    return %c0_i32 : i32
  }
  func.func @transform_7(%arg0: i32, %arg1: i32) -> (i32, i32, i32) {
    %c0_i32 = arith.constant 0 : i32
    %c0_i32_0 = arith.constant 0 : i32
    return %arg0, %c0_i32, %arg1 : i32, i32, i32
  }
}

</mosaic_0001>

<bundles_post_ra>
// kernel: tpu_custom_call.1
= control target key start
LH: loop header
LB: loop body
LE: loop exit
PB: predicated region body
PF: predicated region fallthrough
CT: control target
= control target key end

     0   :  { %s3547_s0 = inlined_call_operand.hbm [shape: f32[2,4,8,256], index: 0, kind: input, shape index: {}]   ;;  %s3548_s1 = inlined_call_operand.vmem [shape: f32[16,4], index: 1, kind: input, shape index: {}]   ;;  %s3549_s2 = inlined_call_operand.vmem [shape: f32[16,1], index: 2, kind: input, shape index: {}]   ;;  %s3550_s3 = inlined_call_operand.vmem [shape: f32[8,16], index: 3, kind: input, shape index: {}]   ;;  %s3551_s4 = inlined_call_operand.vmem [shape: f32[8,1], index: 4, kind: input, shape index: {}]   ;;  %s3552_s5 = inlined_call_operand.vmem [shape: f32[1,8], index: 5, kind: input, shape index: {}]   ;;  %s3553_s6 = inlined_call_operand.<no memory space> [shape: f32[1], index: 6, kind: input, shape index: {}]   ;;  %s3554_s7 = inlined_call_operand.hbm [shape: f32[2,1,256], index: 7, kind: output, shape index: {}]  }
   0x1   :  { %12 = sst [smem:[#allocation2]] %s3553_s6 }
   0x2   :  { %13 = vsyncpa [#allocation4], 0 }
   0x3   :  { %15 = vsyncpa [#allocation4 + $0x1], 0 }
   0x4   :  { %16 = vsyncpa [#allocation5], 0 }
   0x5   :  { %18 = vsyncpa [#allocation5 + $0x1], 0  ;;  %s3064_s26 = smov 0   ;;  %s3066_s27 = smov 0  }
   0x6   :  { %s3068_s28 = smov 0   ;;  %s3070_s29 = smov 0  }
   0x7   :  { %s3072_s30 = smov 0   ;;  %s3074_s8 = smov 0  }
   0x8 LB: > { %s2693_s6 = sadd.s32 4294967295, %s3012_s8   ;;  %s2694_s9 = sadd.s32 4294967294, %s3012_s8   ;;  %s3012_s8 = sphi %s3074_s8, %s24_s8   ;;  %s3008_s30 = sphi %s3072_s30, %s3569_s30   ;;  %s3004_s29 = sphi %s3070_s29, %s3568_s29   ;;  %s3000_s28 = sphi %s3068_s28, %s3567_s28   ;;  %s2996_s27 = sphi %s3066_s27, %s3566_s27   ;;  %s2992_s26 = sphi %s3064_s26, %s3565_s26  }
   0x9   : > { %s36_s10 = sadd.s32 1, %s3008_s30  ;;  %s45_s11 = sadd.s32 1, %s3000_s28 }
   0xa   : > { %p38_p0 = scmp.ge.s32.totalorder %s36_s10, 2  ;;  %p52_p1 = scmp.ne.s32.totalorder %s3000_s28, %s2996_s27 }
   0xb   : > { %p53_p2 = scmp.eq.s32.totalorder %s3012_s8, 0  ;;  %p58_p3 = scmp.ne.s32.totalorder %s2996_s27, %s2992_s26 }
   0xc   : > { %s3571_s10 = smov (%p38_p0, %s36_s10), 0  ;;  %p59_p5 = scmp.eq.s32.totalorder %s2693_s6, 0 }
   0xd   : > { %p3105_p4 = por %p53_p2, %p52_p1  ;;  %s40_s13 = ssub.s32 %s3008_s30, %s3571_s10 }
   0xe   : > { %p210_p6 = scmp.eq.s32.totalorder %s2693_s6, 1  ;;  %p43_p7 = scmp.eq.s32.totalorder %s40_s13, 0 }
   0xf   : > { %p3111_p8 = por %p59_p5, %p58_p3  ;;  %p216_p10 = scmp.eq.s32.totalorder %s2694_s9, 1 }
  0x10   : > { %p3115_p9 = por %p210_p6, %p52_p1  ;;  %p2835_p13 = scmp.lt.s32.totalorder %s3012_s8, 2 }
  0x11   : > { %s3120_s16 = scalar_select %p43_p7, %s3000_s28, %s45_s11  }
  0x12   : > { %s3558_s15 = scalar_select %p3115_p9, 1, 0 }
  0x13   : > { %p3122_p11 = por %p216_p10, %p58_p3  ;;  %s254_s18 = sand.u32 1, %s3000_s28  }
  0x14   : > { %s2697_s19 = sshll.u32 %s254_s18, 6  ;;  %s2789_s20 = sshll.u32 %s3008_s30, 10 }
  0x15   : > { %s3559_s17 = scalar_select %p3122_p11, 1, 0 }
  0x16   : > { %s3133_s23 = scalar_lea.hbm %s3547_s0, %s2789_s20  ;;  %s258_s24 = scalar_lea.vmem [#allocation3], %s2697_s19 }
  0x17   : > { %s267_s25 = sshll.u32 %s258_s24, 4  ;;  %p3139_p0 = pnand %p2835_p13, %p3105_p4  ;;  %s3135_s25 = int_to_ptr.vmem [resolvable:$true] %s267_s25 }
  0x18   : > { %s3144_s9 = scalar_lea.sflag [#allocation4], %s254_s18  ;;  %s2900_s11 = scalar_lea.hbm %s3133_s23, 1024 }
  0x19   : > { %p2901_p2 = scmp.ne.s32.totalorder %s3133_s23, %s2900_s11  ;;  %p2902_p3 = pneg %p3139_p0 }
  0x1a   : > { %s2905_s12 = scalar_lea.hbm %s3547_s0, 2048  ;;  %p2906_p4 = scmp.lt.u32.totalorder %s3133_s23, %s3547_s0 }
  0x1b   : > { %p2903_p5 = pnand %p2902_p3, %p2901_p2  ;;  %p2907_p7 = scmp.lt.u32.totalorder %s2905_s12, %s2900_s11 }
  0x1c   : > { %p2909_p13 = scmp.lt.u32.totalorder %s2900_s11, %s3133_s23 }
  0x1d   : > { %p2904_p6 = pneg %p2903_p5  ;;  %p2908_p10 = por %p2907_p7, %p2906_p4 }
  0x1f   : > { %p2910_p12 = por %p2909_p13, %p2908_p10 }
  0x21   : > { %p2911_p1 = pnand %p2910_p12, %p2904_p6 }
  0x23   : > { %2914 = shalt.err (!%p2911_p1)
}
  0x24   : > { %s2915_s18 = scalar_lea.vmem %s3135_s25, 1024  ;;  %s3014_s22 = smov [#allocation3]  }
  0x25   : > { %p2916_p2 = scmp.ne.s32.totalorder %s3135_s25, %s2915_s18  ;;  %s2920_s24 = sshll.u32 %s3014_s22, 4  ;;  %s2921_s24 = int_to_ptr.vmem [resolvable:$false] %s2920_s24 }
  0x26   : > { %s2922_s13 = scalar_lea.vmem %s2921_s24, 2048  ;;  %p2923_p9 = scmp.lt.s32.totalorder %s3135_s25, %s2921_s24 }
  0x27   : > { %p2918_p5 = pnand %p2916_p2, %p2902_p3  ;;  %p2924_p4 = scmp.lt.s32.totalorder %s2922_s13, %s2915_s18 }
  0x29   : > { %p2919_p11 = pneg %p2918_p5  ;;  %p2925_p7 = por %p2924_p4, %p2923_p9 }
  0x2b   : > { %p2926_p10 = pnand %p2925_p7, %p2919_p11 }
  0x2d   : > { %2929 = shalt.err (!%p2926_p10)
}
  0x2e   : > { %s3015_s11 = smov 256   ;;  %s3016_s19 = smov 16  }
  0x2f   : > { %2830 = dma.hbm_to_vmem [thread:$0]  (!%p3139_p0), %s3133_s23, 1024, %s3135_s25, %s3144_s9, %s3015_s11, %s3015_s11, %s3016_s19  }
  0x30   : > { %p275_p12 = scmp.lt.s32.totalorder %s3012_s8, 3  ;;  %p3561_p1 = scmp.ge.s32.totalorder %s3012_s8, 1 }
  0x32   : > { %p276_p3 = pnand %p3561_p1, %p275_p12 }
  0x33   : > { %s3176_s12 = sand.u32 (!%p276_p3), 1, %s2996_s27  }
  0x34   : > { %279 = sbr.rel (%p276_p3) target bundleno = 2345 (0x929), region = 48  ;;  %s2701_s20 = sshll.u32 (!%p276_p3), %s3176_s12, 6 }
  0x35   : > { %s282_s21 = scalar_lea.sflag (!%p276_p3), [#allocation4], %s3176_s12  ;;  %s3180_s18 = scalar_lea.vmem (!%p276_p3), [#allocation3], %s2701_s20 }
  0x3b   : > { %2983 = dma.done.wait (%p3111_p8), %s282_s21, 1024  }
  0x3c   : > { %2985 = vsyncadd (%p3111_p8), %s282_s21, 4294966272  ;;  %v348_v0 = vlaneseq  ;;  %v3017_v1 = vmov 1966171168   ;;  %v3018_v3 = vmov 0.0   ;;  %v3019_v5 = vmov 0   ;;  %v3217_v40 = vld [vmem:[%s3548_s1] sm:$0xff] }
  0x3d   : > { %v346_v2 = vunpack.c.l.s4 %v3017_v1  ;;  %451 = vmatprep.mubr.f32.mxu0 %v3018_v3  ;;  %543 = vmatprep.mubr.f32.mxu1 %v3018_v3  ;;  %v318_v8 = vld [vmem:[%s3180_s18] ss:$8 sm:$0x3]  ;;  %v2703_v9 = vld [vmem:[%s3180_s18 + $0x10] ss:$8 sm:$0x3] }
  0x3e   : > { %v349_v4 = vshrl.u32 %v348_v0, 7  ;;  %2890 = vset.pattern.permute.xlu0 %v3019_v5  ;;  %2891 = vset.pattern.permute.xlu1 %v3019_v5  ;;  %v2704_v10 = vld [vmem:[%s3180_s18 + $0x20] ss:$8 sm:$0x3]  ;;  %v343_v12 = vcombine.low %v318_v8, %v2703_v9  ;;  %vm382_vm0 = vcmask 1043456   ;;  %vm375_vm1 = vcmask 31744  }
  0x3f   : > { %v347_v6 = vunpack.c.0.s8 %v346_v2  ;;  %v2705_v11 = vld [vmem:[%s3180_s18 + $0x30] ss:$8 sm:$0x3]  ;;  %v2712_v14 = vld [vmem:[%s3180_s18 + $0x1] ss:$8 sm:$0x3] }
  0x40   : > { %v344_v13 = vcombine.low %v2704_v10, %v2705_v11  ;;  %v2713_v16 = vld [vmem:[%s3180_s18 + $0x11] ss:$8 sm:$0x3]  ;;  %v2714_v17 = vld [vmem:[%s3180_s18 + $0x21] ss:$8 sm:$0x3] }
  0x41   : > { %v3189_v7 = vsub.s32 %v347_v6, %v349_v4  ;;  %v2715_v19 = vld [vmem:[%s3180_s18 + $0x31] ss:$8 sm:$0x3]  ;;  %v640_v20 = vcombine.low %v2712_v14, %v2713_v16  ;;  %v2722_v21 = vld [vmem:[%s3180_s18 + $0x2] ss:$8 sm:$0x3] }
  0x42   : > { %v641_v22 = vcombine.low %v2714_v17, %v2715_v19  ;;  %v2723_v23 = vld [vmem:[%s3180_s18 + $0x12] ss:$8 sm:$0x3]  ;;  %v2724_v24 = vld [vmem:[%s3180_s18 + $0x22] ss:$8 sm:$0x3] }
  0x43   : > { %v351_v15 = vrot.slane %v343_v12, %v3189_v7  ;;  %v358_v18 = vrot.slane %v344_v13, %v3189_v7  ;;  %v648_v27 = vrot.slane %v640_v20, %v3189_v7  ;;  %v2725_v28 = vld [vmem:[%s3180_s18 + $0x32] ss:$8 sm:$0x3]  ;;  %v915_v29 = vcombine.low %v2722_v21, %v2723_v23  ;;  %v2732_v30 = vld [vmem:[%s3180_s18 + $0x3] ss:$8 sm:$0x3] }
  0x44   : > { %v655_v31 = vrot.slane %v641_v22, %v3189_v7  ;;  %v916_v32 = vcombine.low %v2724_v24, %v2725_v28  ;;  %v2733_v33 = vld [vmem:[%s3180_s18 + $0x13] ss:$8 sm:$0x3]  ;;  %v2734_v34 = vld [vmem:[%s3180_s18 + $0x23] ss:$8 sm:$0x3] }
  0x45   : > { %v360_v25 = vcombine.high %v351_v15, %v358_v18  ;;  %v359_v26 = vcombine.low %v351_v15, %v358_v18  ;;  %v923_v37 = vrot.slane %v915_v29, %v3189_v7  ;;  %v2735_v38 = vld [vmem:[%s3180_s18 + $0x33] ss:$8 sm:$0x3]  ;;  %v1190_v39 = vcombine.low %v2732_v30, %v2733_v33  ;;  %v2742_v46 = vld [vmem:[%s3180_s18 + $0x4] ss:$8 sm:$0x3] }
  0x46   : > { %v656_v41 = vcombine.low %v648_v27, %v655_v31  ;;  %v657_v42 = vcombine.high %v648_v27, %v655_v31  ;;  %v930_v43 = vrot.slane %v916_v32, %v3189_v7  ;;  %v1191_v44 = vcombine.low %v2734_v34, %v2735_v38  ;;  %v2743_v47 = vld [vmem:[%s3180_s18 + $0x14] ss:$8 sm:$0x3]  ;;  %v2744_v51 = vld [vmem:[%s3180_s18 + $0x24] ss:$8 sm:$0x3] }
  0x47   : > { %v374_v35 = vrot.slane %v360_v25, %v3189_v7  ;;  %v367_v36 = vrot.slane %v359_v26, %v3189_v7  ;;  %v1198_v45 = vrot.slane %v1190_v39, %v3189_v7  ;;  %v2745_v52 = vld [vmem:[%s3180_s18 + $0x34] ss:$8 sm:$0x3]  ;;  %v3236_v54 = vld [vmem:[%s3548_s1 + $0x8] sm:$0xff]  ;;  %v1465_v58 = vcombine.low %v2742_v46, %v2743_v47  ;;  %v327_v60 = vld [vmem:[%s3549_s2] sm:$0xff]  ;;  %s2553_s23 = sld [smem:[#allocation2]] }
  0x48   : > { %v671_v48 = vrot.slane %v657_v42, %v3189_v7  ;;  %v664_v49 = vrot.slane %v656_v41, %v3189_v7  ;;  %v932_v50 = vcombine.high %v923_v37, %v930_v43  ;;  %v1205_v53 = vrot.slane %v1191_v44, %v3189_v7  ;;  %v2752_v62 = vld [vmem:[%s3180_s18 + $0x5] ss:$8 sm:$0x3]  ;;  %v2753_v4 = vld [vmem:[%s3180_s18 + $0x15] ss:$8 sm:$0x3]  ;;  %331 = vperm.xlu0 %2890, %v327_v60  }
  0x49   : > { %2706 = vmatprep.subr.msk.mxu0 %vm382_vm0, %v374_v35  ;;  %v931_v55 = vcombine.low %v923_v37, %v930_v43  ;;  %v1466_v59 = vcombine.low %v2744_v51, %v2745_v52  ;;  %v1473_v1 = vrot.slane %v1465_v58, %v3189_v7  ;;  %v2754_v5 = vld [vmem:[%s3180_s18 + $0x25] ss:$8 sm:$0x3]  ;;  %v2755_v6 = vld [vmem:[%s3180_s18 + $0x35] ss:$8 sm:$0x3]  ;;  %v1740_v11 = vcombine.low %v2752_v62, %v2753_v4 }
  0x4a   : > { %2707 = vmatpush1.msk.msra.mxu0 %vm382_vm0, %v367_v36  ;;  %v946_v56 = vrot.slane %v932_v50, %v3189_v7  ;;  %v1207_v57 = vcombine.high %v1198_v45, %v1205_v53  ;;  %v328_v8 = vld [vmem:[%s3549_s2 + $0x8] sm:$0xff]  ;;  %v1206_v9 = vcombine.low %v1198_v45, %v1205_v53  ;;  %v1741_v12 = vcombine.low %v2754_v5, %v2755_v6  ;;  %v2763_v18 = vld [vmem:[%s3180_s18 + $0x16] ss:$8 sm:$0x3]  ;;  %s2702_s25 = sshll.u32 %s3176_s12, 1  ;;  %s2790_s6 = sshll.u32 %s3004_s29, 5 }
  0x4b   : > { %2708 = vmatmul.mubr.msk.f32.vlgmr.msra.gmra.mrb[0].mxu0 %vm375_vm1, %v3217_v40  ;;  %2716 = vmatprep.subr.msk.mxu0 %vm382_vm0, %v671_v48  ;;  %v939_v61 = vrot.slane %v931_v55, %v3189_v7  ;;  %v1480_v2 = vrot.slane %v1466_v59, %v3189_v7  ;;  %v1748_v15 = vrot.slane %v1740_v11, %v3189_v7  ;;  %v2762_v17 = vld [vmem:[%s3180_s18 + $0x6] ss:$8 sm:$0x3]  ;;  %v2765_v20 = vld [vmem:[%s3180_s18 + $0x36] ss:$8 sm:$0x3]  ;;  %s3498_s11 = scalar_lea.hbm %s3554_s7, %s2790_s6 }
  0x4c   : > { %457 = vmatprep.mubr.f32.mxu0 %v3018_v3  ;;  %2717 = vmatpush1.msk.msra.mxu0 %vm382_vm0, %v664_v49  ;;  %v1221_v63 = vrot.slane %v1207_v57, %v3189_v7  ;;  %v1214_v13 = vrot.slane %v1206_v9, %v3189_v7  ;;  %v1755_v16 = vrot.slane %v1741_v12, %v3189_v7  ;;  %v2764_v19 = vld [vmem:[%s3180_s18 + $0x26] ss:$8 sm:$0x3]  ;;  %v2772_v29 = vld [vmem:[%s3180_s18 + $0x7] ss:$8 sm:$0x3] }
  0x4d   : > { %2726 = vmatprep.subr.msk.mxu0 %vm382_vm0, %v946_v56  ;;  %v1482_v10 = vcombine.high %v1473_v1, %v1480_v2  ;;  %336 = vperm.xlu0 %2890, %v328_v8   ;;  %v1481_v21 = vcombine.low %v1473_v1, %v1480_v2  ;;  %v2015_v23 = vcombine.low %v2762_v17, %v2763_v18  ;;  %v2773_v30 = vld [vmem:[%s3180_s18 + $0x17] ss:$8 sm:$0x3]  ;;  %v2774_v31 = vld [vmem:[%s3180_s18 + $0x27] ss:$8 sm:$0x3] }
  0x4e   : > { %v1757_v22 = vcombine.high %v1748_v15, %v1755_v16  ;;  %v2016_v24 = vcombine.low %v2764_v19, %v2765_v20  ;;  %v2775_v32 = vld [vmem:[%s3180_s18 + $0x37] ss:$8 sm:$0x3]  ;;  %v1756_v33 = vcombine.low %v1748_v15, %v1755_v16  ;;  %v2290_v35 = vcombine.low %v2772_v29, %v2773_v30  ;;  %v469_v48 = vld [vmem:[%s3551_s4] sm:$0xff]  ;;  %s315_s9 = scalar_lea.vmem [#allocation6], %s2702_s25  ;;  %s2593_s29 = scalar_lea.sflag [#allocation5], %s3176_s12 }
  0x4f   : > { %2709 = vmatmul.mubr.msk.f32.gmra.mrb[2].mxu0 %vm375_vm1, %v3236_v54  ;;  %v1496_v14 = vrot.slane %v1482_v10, %v3189_v7  ;;  %v1489_v25 = vrot.slane %v1481_v21, %v3189_v7  ;;  %v2023_v27 = vrot.slane %v2015_v23, %v3189_v7  ;;  %v2291_v36 = vcombine.low %v2774_v31, %v2775_v32  ;;  %v3351_v10 = vld [vmem:[%s3550_s3] sm:$0xff]  ;;  %s2609_s22 = sshll.u32 %s315_s9, 4  ;;  %p3562_p9 = scmp.ne.s32.totalorder %s3558_s15, 0  ;;  %s3500_s22 = int_to_ptr.vmem [resolvable:$true] %s2609_s22 }
  0x50   : > { %740 = vmatprep.mubr.f32.mxu0 %v3018_v3  ;;  %v1771_v26 = vrot.slane %v1757_v22, %v3189_v7  ;;  %v2030_v28 = vrot.slane %v2016_v24, %v3189_v7  ;;  %v1764_v37 = vrot.slane %v1756_v33, %v3189_v7  ;;  %v2298_v39 = vrot.slane %v2290_v35, %v3189_v7  ;;  %s2930_s19 = scalar_lea.vmem %s3500_s22, 32  ;;  %s3020_s20 = smov [#allocation6]  }
  0x51   : > { %v2305_v41 = vrot.slane %v2291_v36, %v3189_v7  ;;  %472 = vperm.xlu1 %2891, %v469_v48   ;;  %vm475_vm2 = vcmask 130048   ;;  %vm553_vm3 = vcmask 64512   ;;  %vm2589_vm4 = vcmp.lt.s32.totalorder %v348_v0, 256  ;;  %p2931_p8 = scmp.ne.s32.totalorder %s3500_s22, %s2930_s19  ;;  %s2934_s21 = sshll.u32 %s3020_s20, 4  ;;  %s2935_s21 = int_to_ptr.vmem [resolvable:$false] %s2934_s21 }
  0x52   : > { %v2032_v34 = vcombine.high %v2023_v27, %v2030_v28  ;;  %v2031_v42 = vcombine.low %v2023_v27, %v2030_v28  ;;  %s2936_s18 = scalar_lea.vmem %s2935_s21, 64  ;;  %p2937_p6 = scmp.lt.s32.totalorder %s3500_s22, %s2935_s21 }
  0x53   : > { %2718 = vmatmul.mubr.msk.f32.vlgmr.msra.gmra.mrb[4].mxu0 %vm375_vm1, %v3217_v40  ;;  %v2307_v43 = vcombine.high %v2298_v39, %v2305_v41  ;;  %v2306_v46 = vcombine.low %v2298_v39, %v2305_v41  ;;  %p2932_p11 = pnand %p2931_p8, %p3562_p9  ;;  %p2938_p13 = scmp.lt.s32.totalorder %s2936_s18, %s2930_s19 }
  0x54   : > { %746 = vmatprep.mubr.f32.mxu0 %v3018_v3  ;;  %2727 = vmatpush1.msk.msra.mxu0 %vm382_vm0, %v939_v61  ;;  %v2046_v38 = vrot.slane %v2032_v34, %v3189_v7  ;;  %v2039_v44 = vrot.slane %v2031_v42, %v3189_v7 }
  0x55   : > { %2736 = vmatprep.subr.msk.mxu0 %vm382_vm0, %v1221_v63  ;;  %v2321_v45 = vrot.slane %v2307_v43, %v3189_v7  ;;  %v2314_v47 = vrot.slane %v2306_v46, %v3189_v7  ;;  %p2933_p0 = pneg %p2932_p11  ;;  %p2939_p2 = por %p2938_p13, %p2937_p6 }
  0x57   : > { %2719 = vmatmul.mubr.msk.f32.gmra.mrb[6].mxu0 %vm375_vm1, %v3236_v54  ;;  %p2940_p5 = pnand %p2939_p2, %p2933_p0 }
  0x58   : > { %1015 = vmatprep.mubr.f32.mxu0 %v3018_v3 }
  0x5b   : > { %2728 = vmatmul.mubr.msk.f32.vlgmr.msra.gmra.mrb[8].mxu0 %vm375_vm1, %v3217_v40 }
  0x5c   : > { %1021 = vmatprep.mubr.f32.mxu0 %v3018_v3  ;;  %2737 = vmatpush1.msk.msra.mxu0 %vm382_vm0, %v1214_v13 }
  0x5d   : > { %2746 = vmatprep.subr.msk.mxu0 %vm382_vm0, %v1496_v14 }
  0x5f   : > { %2729 = vmatmul.mubr.msk.f32.gmra.mrb[10].mxu0 %vm375_vm1, %v3236_v54 }
  0x60   : > { %1290 = vmatprep.mubr.f32.mxu0 %v3018_v3 }
  0x63   : > { %2738 = vmatmul.mubr.msk.f32.vlgmr.msra.gmra.mrb[12].mxu0 %vm375_vm1, %v3217_v40 }
  0x64   : > { %1296 = vmatprep.mubr.f32.mxu0 %v3018_v3  ;;  %2747 = vmatpush1.msk.msra.mxu0 %vm382_vm0, %v1489_v25 }
  0x65   : > { %2756 = vmatprep.subr.msk.mxu0 %vm382_vm0, %v1771_v26 }
  0x67   : > { %2739 = vmatmul.mubr.msk.f32.gmra.mrb[14].mxu0 %vm375_vm1, %v3236_v54 }
  0x68   : > { %1565 = vmatprep.mubr.f32.mxu0 %v3018_v3 }
  0x6b   : > { %2748 = vmatmul.mubr.msk.f32.vlgmr.msra.gmra.mrb[16].mxu0 %vm375_vm1, %v3217_v40 }
  0x6c   : > { %1571 = vmatprep.mubr.f32.mxu0 %v3018_v3  ;;  %2757 = vmatpush1.msk.msra.mxu0 %vm382_vm0, %v1764_v37 }
  0x6d   : > { %2766 = vmatprep.subr.msk.mxu0 %vm382_vm0, %v2046_v38 }
  0x6f   : > { %2749 = vmatmul.mubr.msk.f32.gmra.mrb[18].mxu0 %vm375_vm1, %v3236_v54 }
  0x70   : > { %1840 = vmatprep.mubr.f32.mxu0 %v3018_v3 }
  0x73   : > { %2758 = vmatmul.mubr.msk.f32.vlgmr.msra.gmra.mrb[20].mxu0 %vm375_vm1, %v3217_v40 }
  0x74   : > { %1846 = vmatprep.mubr.f32.mxu0 %v3018_v3  ;;  %2767 = vmatpush1.msk.msra.mxu0 %vm382_vm0, %v2039_v44 }
  0x75   : > { %2776 = vmatprep.subr.msk.mxu0 %vm382_vm0, %v2321_v45 }
  0x77   : > { %2759 = vmatmul.mubr.msk.f32.gmra.mrb[22].mxu0 %vm375_vm1, %v3236_v54 }
  0x78   : > { %2115 = vmatprep.mubr.f32.mxu0 %v3018_v3 }
  0x7b   : > { %2768 = vmatmul.mubr.msk.f32.vlgmr.msra.gmra.mrb[24].mxu0 %vm375_vm1, %v3217_v40 }
  0x7c   : > { %2121 = vmatprep.mubr.f32.mxu0 %v3018_v3  ;;  %2777 = vmatpush1.msk.msra.mxu0 %vm382_vm0, %v2314_v47 }
  0x7f   : > { %2769 = vmatmul.mubr.msk.f32.gmra.mrb[26].mxu0 %vm375_vm1, %v3236_v54 }
  0x80   : > { %2390 = vmatprep.mubr.f32.mxu0 %v3018_v3 }
  0x83   : > { %2778 = vmatmul.mubr.msk.f32.vlgmr.msra.gmra.mrb[28].mxu0 %vm375_vm1, %v3217_v40 }
  0x84   : > { %2396 = vmatprep.mubr.f32.mxu0 %v3018_v3 }
  0x87   : > { %2779 = vmatmul.mubr.msk.f32.gmra.mrb[30].mxu0 %vm375_vm1, %v3236_v54 }
  0xc7   : > { %v3337_v49 = vpop.permute.xlu0 %331 }
  0xcc   : > { %v3340_v53 = vpop.permute.xlu0 %336 }
 0x11e   : > { %v453_v50 = vpop.f32.mrb[0].mxu0 }
 0x11f   : > { %v455_v51 = vpop.f32.mrb[1].mxu0  ;;  %v454_v52 = vadd.f32 %v453_v50, %v3337_v49 }
 0x120   : > { %v456_v40 = vadd.f32 %v455_v51, %v3337_v49 }
 0x121   : > { %v464_v58 = vmax.f32 %v454_v52, 0.0 }
 0x122   : > { %v459_v55 = vpop.f32.mrb[2].mxu0  ;;  %v465_v60 = vmax.f32 %v456_v40, 0.0 }
 0x123   : > { %v460_v56 = vadd.f32 %v459_v55, %v3340_v53  ;;  %v461_v57 = vpop.f32.mrb[3].mxu0 }
 0x124   : > { %v462_v54 = vadd.f32 %v461_v57, %v3340_v53 }
 0x125   : > { %v466_v59 = vmax.f32 %v460_v56, 0.0 }
 0x126   : > { %v467_v61 = vmax.f32 %v462_v54, 0.0  ;;  %v742_v62 = vpop.f32.mrb[4].mxu0 }
 0x127   : > { %v744_v63 = vpop.f32.mrb[5].mxu0  ;;  %v2793_v1 = vpack.c.bf16 %v466_v59, %v464_v58  ;;  %v743_v4 = vadd.f32 %v742_v62, %v3337_v49 }
 0x128   : > { %v2791_v2 = vpack.c.bf16 %v467_v61, %v465_v60  ;;  %v745_v5 = vadd.f32 %v744_v63, %v3337_v49 }
 0x129   : > { %v753_v12 = vmax.f32 %v743_v4, 0.0 }
 0x12a   : > { %2792 = vmatprep.subr.bf16.mxu1 %v2791_v2  ;;  %v748_v6 = vpop.f32.mrb[6].mxu0  ;;  %v754_v14 = vmax.f32 %v745_v5, 0.0 }
 0x12b   : > { %v749_v8 = vadd.f32 %v748_v6, %v3340_v53  ;;  %2794 = vmatpush1.bf16.msra.mxu1 %v2793_v1  ;;  %v750_v9 = vpop.f32.mrb[7].mxu0 }
 0x12c   : > { %v751_v11 = vadd.f32 %v750_v9, %v3340_v53 }
 0x12d   : > { %v755_v13 = vmax.f32 %v749_v8, 0.0 }
 0x12e   : > { %v756_v15 = vmax.f32 %v751_v11, 0.0  ;;  %2710 = vmatmul.mubr.msk.f32.vlgmr.msra.gmra.mrb[0].mxu1 %vm475_vm2, %v3351_v10  ;;  %v1017_v16 = vpop.f32.mrb[8].mxu0 }
 0x12f   : > { %v3356_v17 = vpack.c.bf16 %v755_v13, %v753_v12  ;;  %v1019_v18 = vpop.f32.mrb[9].mxu0  ;;  %621 = vmatprep.mubr.f32.mxu1 %v3018_v3  ;;  %v1018_v20 = vadd.f32 %v1017_v16, %v3337_v49 }
 0x130   : > { %v3359_v19 = vpack.c.bf16 %v756_v15, %v754_v14  ;;  %v1020_v21 = vadd.f32 %v1019_v18, %v3337_v49 }
 0x131   : > { %v1028_v26 = vmax.f32 %v1018_v20, 0.0 }
 0x132   : > { %v1023_v22 = vpop.f32.mrb[10].mxu0  ;;  %v1029_v28 = vmax.f32 %v1020_v21, 0.0 }
 0x133   : > { %v1024_v23 = vadd.f32 %v1023_v22, %v3340_v53  ;;  %v1025_v24 = vpop.f32.mrb[11].mxu0 }
 0x134   : > { %v1026_v25 = vadd.f32 %v1025_v24, %v3340_v53 }
 0x135   : > { %v1030_v27 = vmax.f32 %v1024_v23, 0.0 }
 0x136   : > { %v1031_v29 = vmax.f32 %v1026_v25, 0.0  ;;  %v1292_v30 = vpop.f32.mrb[12].mxu0 }
 0x137   : > { %v3365_v31 = vpack.c.bf16 %v1030_v27, %v1028_v26  ;;  %v1294_v32 = vpop.f32.mrb[13].mxu0  ;;  %v1293_v34 = vadd.f32 %v1292_v30, %v3337_v49 }
 0x138   : > { %v3367_v33 = vpack.c.bf16 %v1031_v29, %v1029_v28  ;;  %v1295_v35 = vadd.f32 %v1294_v32, %v3337_v49 }
 0x139   : > { %v1303_v41 = vmax.f32 %v1293_v34, 0.0 }
 0x13a   : > { %v1298_v36 = vpop.f32.mrb[14].mxu0  ;;  %v1304_v43 = vmax.f32 %v1295_v35, 0.0 }
 0x13b   : > { %v1299_v37 = vadd.f32 %v1298_v36, %v3340_v53  ;;  %v1300_v38 = vpop.f32.mrb[15].mxu0 }
 0x13c   : > { %v1301_v39 = vadd.f32 %v1300_v38, %v3340_v53 }
 0x13d   : > { %v1305_v42 = vmax.f32 %v1299_v37, 0.0 }
 0x13e   : > { %v1306_v44 = vmax.f32 %v1301_v39, 0.0  ;;  %v1567_v45 = vpop.f32.mrb[16].mxu0 }
 0x13f   : > { %v3373_v46 = vpack.c.bf16 %v1305_v42, %v1303_v41  ;;  %v1569_v47 = vpop.f32.mrb[17].mxu0  ;;  %v1568_v50 = vadd.f32 %v1567_v45, %v3337_v49 }
 0x140   : > { %v3375_v48 = vpack.c.bf16 %v1306_v44, %v1304_v43  ;;  %v1570_v51 = vadd.f32 %v1569_v47, %v3337_v49 }
 0x141   : > { %v1578_v57 = vmax.f32 %v1568_v50, 0.0 }
 0x142   : > { %v1573_v52 = vpop.f32.mrb[18].mxu0  ;;  %v1579_v58 = vmax.f32 %v1570_v51, 0.0 }
 0x143   : > { %v1574_v40 = vadd.f32 %v1573_v52, %v3340_v53  ;;  %v1575_v55 = vpop.f32.mrb[19].mxu0  ;;  %v3409_v52 = vpop.permute.xlu1 %472 }
 0x144   : > { %v1576_v56 = vadd.f32 %v1575_v55, %v3340_v53 }
 0x145   : > { %v1580_v54 = vmax.f32 %v1574_v40, 0.0 }
 0x146   : > { %v1581_v59 = vmax.f32 %v1576_v56, 0.0  ;;  %v1842_v60 = vpop.f32.mrb[20].mxu0 }
 0x147   : > { %v3381_v61 = vpack.c.bf16 %v1580_v54, %v1578_v57  ;;  %v1844_v62 = vpop.f32.mrb[21].mxu0  ;;  %v1843_v1 = vadd.f32 %v1842_v60, %v3337_v49 }
 0x148   : > { %v3383_v63 = vpack.c.bf16 %v1581_v59, %v1579_v58  ;;  %v1845_v2 = vadd.f32 %v1844_v62, %v3337_v49 }
 0x149   : > { %v1853_v9 = vmax.f32 %v1843_v1, 0.0 }
 0x14a   : > { %v1848_v4 = vpop.f32.mrb[22].mxu0  ;;  %v1854_v12 = vmax.f32 %v1845_v2, 0.0 }
 0x14b   : > { %v1849_v5 = vadd.f32 %v1848_v4, %v3340_v53  ;;  %v1850_v6 = vpop.f32.mrb[23].mxu0 }
 0x14c   : > { %v1851_v8 = vadd.f32 %v1850_v6, %v3340_v53 }
 0x14d   : > { %v1855_v11 = vmax.f32 %v1849_v5, 0.0 }
 0x14e   : > { %v1856_v13 = vmax.f32 %v1851_v8, 0.0  ;;  %v2117_v14 = vpop.f32.mrb[24].mxu0 }
 0x14f   : > { %v3389_v15 = vpack.c.bf16 %v1855_v11, %v1853_v9  ;;  %v2119_v16 = vpop.f32.mrb[25].mxu0  ;;  %v2118_v20 = vadd.f32 %v2117_v14, %v3337_v49 }
 0x150   : > { %v3391_v18 = vpack.c.bf16 %v1856_v13, %v1854_v12  ;;  %v2120_v21 = vadd.f32 %v2119_v16, %v3337_v49 }
 0x151   : > { %v2128_v26 = vmax.f32 %v2118_v20, 0.0 }
 0x152   : > { %v2123_v22 = vpop.f32.mrb[26].mxu0  ;;  %v2129_v28 = vmax.f32 %v2120_v21, 0.0 }
 0x153   : > { %v2124_v23 = vadd.f32 %v2123_v22, %v3340_v53  ;;  %v2125_v24 = vpop.f32.mrb[27].mxu0 }
 0x154   : > { %v2126_v25 = vadd.f32 %v2125_v24, %v3340_v53 }
 0x155   : > { %v2130_v27 = vmax.f32 %v2124_v23, 0.0 }
 0x156   : > { %v2131_v29 = vmax.f32 %v2126_v25, 0.0  ;;  %v2392_v30 = vpop.f32.mrb[28].mxu0 }
 0x157   : > { %v3397_v32 = vpack.c.bf16 %v2130_v27, %v2128_v26  ;;  %v2394_v34 = vpop.f32.mrb[29].mxu0  ;;  %v2393_v36 = vadd.f32 %v2392_v30, %v3337_v49 }
 0x158   : > { %v3399_v35 = vpack.c.bf16 %v2131_v29, %v2129_v28  ;;  %v2395_v37 = vadd.f32 %v2394_v34, %v3337_v49 }
 0x159   : > { %v2403_v43 = vmax.f32 %v2393_v36, 0.0 }
 0x15a   : > { %v2398_v38 = vpop.f32.mrb[30].mxu0  ;;  %v2404_v45 = vmax.f32 %v2395_v37, 0.0 }
 0x15b   : > { %v2399_v39 = vadd.f32 %v2398_v38, %v3340_v53  ;;  %v2400_v41 = vpop.f32.mrb[31].mxu0 }
 0x15c   : > { %v2401_v42 = vadd.f32 %v2400_v41, %v3340_v53  ;;  %v3416_v53 = vld [vmem:[%s3552_s5] sm:$0x1] }
 0x15d   : > { %v2405_v44 = vmax.f32 %v2399_v39, 0.0 }
 0x15e   : > { %v2406_v47 = vmax.f32 %v2401_v42, 0.0 }
 0x15f   : > { %v3405_v50 = vpack.c.bf16 %v2405_v44, %v2403_v43 }
 0x160   : > { %v3407_v51 = vpack.c.bf16 %v2406_v47, %v2404_v45 }
 0x201   : > { %v545_v40 = vpop.f32.mrb[0].mxu1 }
 0x202   : > { %v546_v55 = vadd.f32 %v545_v40, %v3409_v52  ;;  %v547_v49 = vpop.f32.mrb[1].mxu1 }
 0x203   : > { %v548_v56 = vadd.f32 %v547_v49, %v3409_v52 }
 0x204   : > { %v550_v54 = vmax.f32 %v546_v55, 0.0 }
 0x205   : > { %v551_v57 = vmax.f32 %v548_v56, 0.0 }
 0x207   : > { %557 = vmatprep.subr.mxu1 %v551_v57 }
 0x208   : > { %558 = vmatpush1.msra.mxu1 %v550_v54 }
 0x209   : > { %2711 = vmatmul.mubr.msk.f32.vlgmr.msra.gmra.mrb[2].mxu1 %vm553_vm3, %v3416_v53  ;;  %2796 = vmatprep.subr.bf16.mxu1 %v3359_v19 }
 0x20a   : > { %2798 = vmatpush1.bf16.msra.mxu1 %v3356_v17  ;;  %821 = vmatprep.mubr.f32.mxu1 %v3018_v3 }
 0x20d   : > { %2720 = vmatmul.mubr.msk.f32.vlgmr.msra.gmra.mrb[4].mxu1 %vm475_vm2, %v3351_v10 }
 0x20e   : > { %894 = vmatprep.mubr.f32.mxu1 %v3018_v3 }
 0x2dc   : > { %v623_v58 = vpop.f32.mrb[2].mxu1 }
 0x2dd   : > { %v625_v59 = vpop.f32.mrb[3].mxu1 }
 0x2e0   : > { %v823_v60 = vpop.f32.mrb[4].mxu1 }
 0x2e1   : > { %v824_v62 = vadd.f32 %v823_v60, %v3409_v52  ;;  %v825_v1 = vpop.f32.mrb[5].mxu1 }
 0x2e2   : > { %v826_v2 = vadd.f32 %v825_v1, %v3409_v52 }
 0x2e3   : > { %v828_v5 = vmax.f32 %v824_v62, 0.0 }
 0x2e4   : > { %v829_v4 = vmax.f32 %v826_v2, 0.0 }
 0x2e6   : > { %830 = vmatprep.subr.mxu1 %v829_v4 }
 0x2e7   : > { %831 = vmatpush1.msra.mxu1 %v828_v5 }
 0x2e8   : > { %2721 = vmatmul.mubr.msk.f32.vlgmr.msra.gmra.mrb[6].mxu1 %vm553_vm3, %v3416_v53  ;;  %2800 = vmatprep.subr.bf16.mxu1 %v3367_v33 }
 0x2e9   : > { %2802 = vmatpush1.bf16.msra.mxu1 %v3365_v31  ;;  %1096 = vmatprep.mubr.f32.mxu1 %v3018_v3 }
 0x2ec   : > { %2730 = vmatmul.mubr.msk.f32.vlgmr.msra.gmra.mrb[8].mxu1 %vm475_vm2, %v3351_v10 }
 0x2ed   : > { %1169 = vmatprep.mubr.f32.mxu1 %v3018_v3 }
 0x3bb   : > { %v896_v17 = vpop.f32.mrb[6].mxu1 }
 0x3bc   : > { %v901_v19 = vmax.f32 %v623_v58, %v896_v17  ;;  %v898_v6 = vpop.f32.mrb[7].mxu1 }
 0x3bd   : > { %v902_v8 = vmax.f32 %v625_v59, %v898_v6 }
 0x3bf   : > { %v1098_v9 = vpop.f32.mrb[8].mxu1 }
 0x3c0   : > { %v1099_v11 = vadd.f32 %v1098_v9, %v3409_v52  ;;  %v1100_v12 = vpop.f32.mrb[9].mxu1 }
 0x3c1   : > { %v1101_v13 = vadd.f32 %v1100_v12, %v3409_v52 }
 0x3c2   : > { %v1103_v14 = vmax.f32 %v1099_v11, 0.0 }
 0x3c3   : > { %v1104_v33 = vmax.f32 %v1101_v13, 0.0 }
 0x3c5   : > { %1105 = vmatprep.subr.mxu1 %v1104_v33 }
 0x3c6   : > { %1106 = vmatpush1.msra.mxu1 %v1103_v14 }
 0x3c7   : > { %2731 = vmatmul.mubr.msk.f32.vlgmr.msra.gmra.mrb[10].mxu1 %vm553_vm3, %v3416_v53  ;;  %2804 = vmatprep.subr.bf16.mxu1 %v3375_v48 }
 0x3c8   : > { %2806 = vmatpush1.bf16.msra.mxu1 %v3373_v46  ;;  %1371 = vmatprep.mubr.f32.mxu1 %v3018_v3 }
 0x3cb   : > { %2740 = vmatmul.mubr.msk.f32.vlgmr.msra.gmra.mrb[12].mxu1 %vm475_vm2, %v3351_v10 }
 0x3cc   : > { %1444 = vmatprep.mubr.f32.mxu1 %v3018_v3 }
 0x49a   : > { %v1171_v31 = vpop.f32.mrb[10].mxu1 }
 0x49b   : > { %v1176_v16 = vmax.f32 %v901_v19, %v1171_v31  ;;  %v1173_v20 = vpop.f32.mrb[11].mxu1 }
 0x49c   : > { %v1177_v21 = vmax.f32 %v902_v8, %v1173_v20 }
 0x49e   : > { %v1373_v22 = vpop.f32.mrb[12].mxu1 }
 0x49f   : > { %v1374_v23 = vadd.f32 %v1373_v22, %v3409_v52  ;;  %v1375_v24 = vpop.f32.mrb[13].mxu1 }
 0x4a0   : > { %v1376_v25 = vadd.f32 %v1375_v24, %v3409_v52 }
 0x4a1   : > { %v1378_v26 = vmax.f32 %v1374_v23, 0.0 }
 0x4a2   : > { %v1379_v48 = vmax.f32 %v1376_v25, 0.0 }
 0x4a4   : > { %1380 = vmatprep.subr.mxu1 %v1379_v48 }
 0x4a5   : > { %1381 = vmatpush1.msra.mxu1 %v1378_v26 }
 0x4a6   : > { %2741 = vmatmul.mubr.msk.f32.vlgmr.msra.gmra.mrb[14].mxu1 %vm553_vm3, %v3416_v53  ;;  %2808 = vmatprep.subr.bf16.mxu1 %v3383_v63 }
 0x4a7   : > { %2810 = vmatpush1.bf16.msra.mxu1 %v3381_v61  ;;  %1646 = vmatprep.mubr.f32.mxu1 %v3018_v3 }
 0x4aa   : > { %2750 = vmatmul.mubr.msk.f32.vlgmr.msra.gmra.mrb[16].mxu1 %vm475_vm2, %v3351_v10 }
 0x4ab   : > { %1719 = vmatprep.mubr.f32.mxu1 %v3018_v3 }
 0x579   : > { %v1446_v46 = vpop.f32.mrb[14].mxu1 }
 0x57a   : > { %v1451_v27 = vmax.f32 %v1176_v16, %v1446_v46  ;;  %v1448_v28 = vpop.f32.mrb[15].mxu1 }
 0x57b   : > { %v1452_v29 = vmax.f32 %v1177_v21, %v1448_v28 }
 0x57d   : > { %v1648_v30 = vpop.f32.mrb[16].mxu1 }
 0x57e   : > { %v1649_v34 = vadd.f32 %v1648_v30, %v3409_v52  ;;  %v1650_v36 = vpop.f32.mrb[17].mxu1 }
 0x57f   : > { %v1651_v37 = vadd.f32 %v1650_v36, %v3409_v52 }
 0x580   : > { %v1653_v38 = vmax.f32 %v1649_v34, 0.0 }
 0x581   : > { %v1654_v63 = vmax.f32 %v1651_v37, 0.0 }
 0x583   : > { %1655 = vmatprep.subr.mxu1 %v1654_v63 }
 0x584   : > { %1656 = vmatpush1.msra.mxu1 %v1653_v38 }
 0x585   : > { %2751 = vmatmul.mubr.msk.f32.vlgmr.msra.gmra.mrb[18].mxu1 %vm553_vm3, %v3416_v53  ;;  %2812 = vmatprep.subr.bf16.mxu1 %v3391_v18 }
 0x586   : > { %2814 = vmatpush1.bf16.msra.mxu1 %v3389_v15  ;;  %1921 = vmatprep.mubr.f32.mxu1 %v3018_v3 }
 0x589   : > { %2760 = vmatmul.mubr.msk.f32.vlgmr.msra.gmra.mrb[20].mxu1 %vm475_vm2, %v3351_v10 }
 0x58a   : > { %1994 = vmatprep.mubr.f32.mxu1 %v3018_v3 }
 0x658   : > { %v1721_v61 = vpop.f32.mrb[18].mxu1 }
 0x659   : > { %v1726_v39 = vmax.f32 %v1451_v27, %v1721_v61  ;;  %v1723_v41 = vpop.f32.mrb[19].mxu1 }
 0x65a   : > { %v1727_v42 = vmax.f32 %v1452_v29, %v1723_v41 }
 0x65c   : > { %v1923_v43 = vpop.f32.mrb[20].mxu1 }
 0x65d   : > { %v1924_v44 = vadd.f32 %v1923_v43, %v3409_v52  ;;  %v1925_v45 = vpop.f32.mrb[21].mxu1 }
 0x65e   : > { %v1926_v47 = vadd.f32 %v1925_v45, %v3409_v52 }
 0x65f   : > { %v1928_v40 = vmax.f32 %v1924_v44, 0.0 }
 0x660   : > { %v1929_v18 = vmax.f32 %v1926_v47, 0.0 }
 0x662   : > { %1930 = vmatprep.subr.mxu1 %v1929_v18 }
 0x663   : > { %1931 = vmatpush1.msra.mxu1 %v1928_v40 }
 0x664   : > { %2761 = vmatmul.mubr.msk.f32.vlgmr.msra.gmra.mrb[22].mxu1 %vm553_vm3, %v3416_v53  ;;  %2816 = vmatprep.subr.bf16.mxu1 %v3399_v35 }
 0x665   : > { %2818 = vmatpush1.bf16.msra.mxu1 %v3397_v32  ;;  %2196 = vmatprep.mubr.f32.mxu1 %v3018_v3 }
 0x668   : > { %2770 = vmatmul.mubr.msk.f32.vlgmr.msra.gmra.mrb[24].mxu1 %vm475_vm2, %v3351_v10 }
 0x669   : > { %2269 = vmatprep.mubr.f32.mxu1 %v3018_v3 }
 0x737   : > { %v1996_v15 = vpop.f32.mrb[22].mxu1 }
 0x738   : > { %v2001_v55 = vmax.f32 %v1726_v39, %v1996_v15  ;;  %v1998_v49 = vpop.f32.mrb[23].mxu1 }
 0x739   : > { %v2002_v56 = vmax.f32 %v1727_v42, %v1998_v49 }
 0x73b   : > { %v2198_v57 = vpop.f32.mrb[24].mxu1 }
 0x73c   : > { %v2199_v54 = vadd.f32 %v2198_v57, %v3409_v52  ;;  %v2200_v58 = vpop.f32.mrb[25].mxu1 }
 0x73d   : > { %v2201_v59 = vadd.f32 %v2200_v58, %v3409_v52 }
 0x73e   : > { %v2203_v60 = vmax.f32 %v2199_v54, 0.0 }
 0x73f   : > { %v2204_v35 = vmax.f32 %v2201_v59, 0.0 }
 0x741   : > { %2205 = vmatprep.subr.mxu1 %v2204_v35 }
 0x742   : > { %2206 = vmatpush1.msra.mxu1 %v2203_v60 }
 0x743   : > { %2771 = vmatmul.mubr.msk.f32.vlgmr.msra.gmra.mrb[26].mxu1 %vm553_vm3, %v3416_v53  ;;  %2820 = vmatprep.subr.bf16.mxu1 %v3407_v51 }
 0x744   : > { %2822 = vmatpush1.bf16.msra.mxu1 %v3405_v50  ;;  %2471 = vmatprep.mubr.f32.mxu1 %v3018_v3 }
 0x747   : > { %2780 = vmatmul.mubr.msk.f32.vlgmr.msra.gmra.mrb[28].mxu1 %vm475_vm2, %v3351_v10 }
 0x748   : > { %2544 = vmatprep.mubr.f32.mxu1 %v3018_v3  ;;  %v2554_v3 = vstv %s2553_s23 }
 0x816   : > { %v2271_v32 = vpop.f32.mrb[26].mxu1 }
 0x817   : > { %v2276_v62 = vmax.f32 %v2001_v55, %v2271_v32  ;;  %v2273_v1 = vpop.f32.mrb[27].mxu1 }
 0x818   : > { %v2277_v2 = vmax.f32 %v2002_v56, %v2273_v1 }
 0x81a   : > { %v2473_v4 = vpop.f32.mrb[28].mxu1 }
 0x81b   : > { %v2474_v5 = vadd.f32 %v2473_v4, %v3409_v52  ;;  %v2475_v17 = vpop.f32.mrb[29].mxu1 }
 0x81c   : > { %v2476_v19 = vadd.f32 %v2475_v17, %v3409_v52 }
 0x81d   : > { %v2478_v6 = vmax.f32 %v2474_v5, 0.0 }
 0x81e   : > { %v2479_v51 = vmax.f32 %v2476_v19, 0.0 }
 0x820   : > { %2480 = vmatprep.subr.mxu1 %v2479_v51 }
 0x821   : > { %2481 = vmatpush1.msra.mxu1 %v2478_v6 }
 0x822   : > { %2781 = vmatmul.mubr.msk.f32.vlgmr.msra.gmra.mrb[30].mxu1 %vm553_vm3, %v3416_v53 }
 0x8f5   : > { %v2546_v10 = vpop.f32.mrb[30].mxu1 }
 0x8f6   : > { %v2551_v50 = vmax.f32 %v2276_v62, %v2546_v10  ;;  %v2548_v8 = vpop.f32.mrb[31].mxu1 }
 0x8f7   : > { %v2552_v9 = vmax.f32 %v2277_v2, %v2548_v8 }
 0x8f8   : > { %v2555_v11 = vadd.f32 %v2554_v3, %v2551_v50 }
 0x8f9   : > { %v2556_v12 = vadd.f32 %v2554_v3, %v2552_v9 }
 0x8fa   : > { %v2782_v13 = vmul.f32 -1.442695, %v2555_v11 }
 0x8fb   : > { %v2783_v33 = vmul.f32 -1.442695, %v2556_v12 }
 0x8fc   : > { %2892 = vpow2.f32 %v2782_v13 }
 0x8fd   : > { %2894 = vpow2.f32 %v2783_v33 }
 0x906   : > { %v2893_v52 = vpop.eup %2892 }
 0x907   : > { %v2895_v14 = vpop.eup %2894  ;;  %v2563_v31 = vadd.f32 1.0, %v2893_v52 }
 0x908   : > { %v2564_v16 = vadd.f32 1.0, %v2895_v14 }
 0x909   : > { %2896 = vrcp.f32 %v2563_v31 }
 0x90a   : > { %2898 = vrcp.f32 %v2564_v16 }
 0x913   : > { %v2897_v53 = vpop.eup %2896 }
 0x914   : > { %v2899_v20 = vpop.eup %2898 }
 0x915   : > { %v2571_v21 = vcombine.low %v2897_v53, %v2899_v20 }
 0x917   : > { %v2578_v22 = vrot.slane %v2571_v21, %v3189_v7 }
 0x919   : > { %v2585_v23 = vrot.slane %v2578_v22, %v3189_v7 }
 0x91b   : > { %2591 = vst.msk [vmem:[%s315_s9] sm:$0x3] %vm2589_vm4, %v2585_v23 }
 0x91c   : > { %2943 = shalt.err (!%p2940_p5)
}
 0x91d   : > { %s2944_s12 = scalar_lea.hbm %s3498_s11, 32  ;;  %s2948_s25 = scalar_lea.hbm %s3554_s7, 64 }
 0x91e   : > { %p2945_p4 = scmp.ne.s32.totalorder %s3498_s11, %s2944_s12  ;;  %p2949_p12 = scmp.lt.u32.totalorder %s3498_s11, %s3554_s7 }
 0x91f   : > { %p2950_p1 = scmp.lt.u32.totalorder %s2948_s25, %s2944_s12  ;;  %p2952_p8 = scmp.lt.u32.totalorder %s2944_s12, %s3498_s11 }
 0x920   : > { %p2946_p7 = pnand %p2945_p4, %p3562_p9 }
 0x921   : > { %p2951_p3 = por %p2950_p1, %p2949_p12 }
 0x922   : > { %p2947_p10 = pneg %p2946_p7 }
 0x923   : > { %p2953_p11 = por %p2952_p8, %p2951_p3 }
 0x925   : > { %p2954_p0 = pnand %p2953_p11, %p2947_p10 }
 0x927   : > { %2957 = shalt.err (!%p2954_p0)
}
 0x928   : > { %2825 = dma.vmem_to_hbm [thread:$0]  (%p3562_p9), %s3500_s22, 32, %s3498_s11, %s2593_s29  }
 0x929 PF: > { %s2621_s24 = sand.u32 1, %s2992_s26   ;;  %p3563_p6 = scmp.ne.s32.totalorder %s3559_s17, 0 }
 0x92a   : > { %p3564_p13 = scmp.ge.s32.totalorder %s3012_s8, 2  ;;  %s2622_s13 = scalar_lea.sflag [#allocation5], %s2621_s24 }
 0x92c   : > { %p2832_p2 = pnand %p3564_p13, %p3563_p6 }
 0x92e   : > { %2987 = dma.done.wait (!%p2832_p2), %s2622_s13, 32  }
 0x92f   : > { %2989 = vsyncadd (!%p2832_p2), %s2622_s13, 4294967264  ;;  %s24_s8 = sadd.s32 1, %s3012_s8   ;;  %s3565_s26 = smov %s2996_s27 }
 0x930   : > { %p21_p5 = scmp.ge.s32.totalorder %s24_s8, 4   ;;  %s3566_s27 = smov %s3000_s28 }
 0x931   : > { %s3567_s28 = smov %s3120_s16  ;;  %s3568_s29 = smov %s3008_s30 }
 0x932   : > { %s3569_s30 = smov %s3571_s10  ;;  %23 = sbr.rel (!%p21_p5) target bundleno = 8 (0x8), region = 124 }
 0x939   :  { %2627 = vsyncpa [#allocation4], 1 }
 0x93a   :  { %2629 = vsyncpa [#allocation4 + $0x1], 1 }
 0x93b   :  { %2630 = vsyncpa [#allocation5], 1 }
 0x93c   :  { %2632 = vsyncpa [#allocation5 + $0x1], 1 }

</bundles_post_ra>
